<compile_context>
chip_gen: v6e
topology: v6e:2x2x1
jax: 0.10.0
libtpu: 0.0.40
codegen_flags: <defaults>
</compile_context>

<pallas_src>
import numpy as np
import jax
import jax.numpy as jnp
from jax.experimental import pallas as pl
from jax.experimental.pallas import tpu as pltpu


# ----------------------------- constants (host-side glue) -----------------------------

def _hann_periodic(n_fft):
    n = np.arange(n_fft)
    return 0.5 * (1.0 - np.cos(2.0 * np.pi * n / n_fft))


def _istft_constants(n_fft, hop, n_frames):
    """Fused (cos ; sin) windowed irfft basis and reciprocal overlap-added window^2."""
    n_freq = n_fft // 2 + 1
    l_out = hop * (n_frames - 1)                       # center=True, length=None
    win = _hann_periodic(n_fft)

    k = np.arange(n_freq)[:, None]
    n = np.arange(n_fft)[None, :]
    coeff = np.full((n_freq, 1), 2.0)
    coeff[0] = 1.0
    if n_fft % 2 == 0:
        coeff[-1] = 1.0                                # DC / Nyquist counted once
    ang = 2.0 * np.pi * k * n / n_fft
    crw = coeff * np.cos(ang) / n_fft * win[None, :]   # (F, n_fft)  -> multiplies Re(X)
    ciw = -coeff * np.sin(ang) / n_fft * win[None, :]  # (F, n_fft)  -> multiplies Im(X)
    basis = np.concatenate([crw, ciw], axis=0)         # (2F, n_fft): [real ; imag]

    # overlap-added squared-window envelope on the center-trimmed output region
    l_full = n_fft + hop * (n_frames - 1)
    env = np.zeros(l_full, np.float64)
    w2 = win ** 2
    for t in range(n_frames):
        env[t * hop:t * hop + n_fft] += w2
    env_trim = env[n_fft // 2:n_fft // 2 + l_out]
    if np.min(env_trim) < 1e-11:
        # mirror torch.istft, which errors on non-NOLA window/hop combinations
        raise ValueError("window overlap-add is (near) zero; NOLA constraint violated")
    env_inv = (1.0 / env_trim).reshape(n_frames - 1, hop)
    return basis, env_inv, l_out


# ----------------------------- tiling heuristics -----------------------------

def _choose_f_tile(k_dim, f_tile_max=512):
    """Largest multiple of 128 (<= f_tile_max) dividing k_dim padded to a multiple of 128."""
    k128 = ((k_dim + 127) // 128) * 128
    best = 128
    t = 128
    while t <= min(f_tile_max, k128):
        if k128 % t == 0:
            best = t
        t += 128
    return best, k128


def _choose_group(bc, group_max=8):
    """Batch*channel items per grid step; prefer >= 2 groups so megacore has work."""
    divs = [g for g in range(1, min(bc, group_max) + 1) if bc % g == 0]
    multi = [g for g in divs if bc // g >= 2]
    return max(multi) if multi else max(divs)


def _choose_col_tile(n_fft, hop, m_rows, f_tile, basis_itemsize, budget=6 << 20):
    """n_fft column tile: multiple of hop, lane-dense (or full), VMEM-budgeted."""
    r = n_fft // hop
    candidates = []
    for k in range(1, r + 1):
        ct = k * hop
        if n_fft % ct:
            continue
        if ct != n_fft and ct % 128 != 0:
            continue
        candidates.append(ct)
    best = None
    for ct in candidates:
        cost = 2 * f_tile * ct * basis_itemsize + m_rows * ct * 4   # dbl-buf basis + acc
        if cost <= budget:
            best = ct if best is None else max(best, ct)
    return best if best is not None else min(candidates)


def _vmem_limit_bytes(need_bytes):
    cap = 64 << 20
    try:
        info = pltpu.get_tpu_info()
        cap = int(getattr(info, "vmem_capacity_bytes", cap) or cap)
    except Exception:
        pass
    limit = max(int(1.25 * need_bytes) + (4 << 20), 32 << 20)
    return int(min(limit, max(int(0.75 * cap), need_bytes + (4 << 20))))


# ----------------------------------------- kernel -----------------------------------------

def _make_istft_kernel(group, n_frames, hop, rc, r):
    """group: bc items per step; rc = col_tile // hop; r = n_fft // hop (even)."""
    rows_per_item = n_frames + r - 1
    trim = r // 2

    def kernel(spec_ref, basis_ref, envinv_ref, o_ref, accmm_ref, accoa_ref):
        j = pl.program_id(1)                       # n_fft column tile
        f = pl.program_id(2)                       # frequency (contraction) tile
        last_f = f == pl.num_programs(2) - 1
        last_j = j == pl.num_programs(1) - 1

        @pl.when(f == 0)
        def _zero_mm():
            accmm_ref[...] = jnp.zeros_like(accmm_ref)

        @pl.when((j == 0) & (f == 0))
        def _zero_oa():
            accoa_ref[...] = jnp.zeros_like(accoa_ref)

        # windowed irfft of every frame of every item in the group, for this (f, j) tile:
        # (group*T, f_tile) @ (f_tile, col_tile), bf16 in, f32 accumulate on the MXU.
        accmm_ref[...] += jnp.dot(spec_ref[0], basis_ref[...],
                                  preferred_element_type=jnp.float32)

        # overlap-add once the contraction over frequency tiles is complete: hop-chunk c of
        # column tile j of frame t lands in row (t + j*rc + c) of that item's accumulator.
        @pl.when(last_f)
        def _overlap_add():
            for q in range(group):
                base = q * rows_per_item
                for c in range(rc):
                    blk = accmm_ref[pl.ds(q * n_frames, n_frames), pl.ds(c * hop, hop)]
                    row0 = base + j * rc + c
                    cur = accoa_ref[pl.ds(row0, n_frames), :]
                    accoa_ref[pl.ds(row0, n_frames), :] = cur + blk

        # center trim + window-envelope normalization; write the whole group's output.
        @pl.when(last_f & last_j)
        def _finish():
            env = envinv_ref[...]
            for q in range(group):
                rows = accoa_ref[pl.ds(q * rows_per_item + trim, n_frames - 1), :]
                o_ref[q] = rows * env

    return kernel


# ----------------------------------------- wrapper -----------------------------------------

def my_istft(spec_real, spec_imag, n_fft, hop, length=None, *,
             compute_dtype=jnp.bfloat16, col_tile=None, f_tile_max=512, group_max=8):
    """Equivalent of myISTFT.forward for (B, C, n_fft//2+1, T) complex input given as two
    real planes. Returns (B, C, L) float32 waveform."""
    b, c, n_freq, n_frames = spec_real.shape
    assert n_freq == n_fft // 2 + 1
    assert n_frames >= 2
    assert n_fft % hop == 0
    r = n_fft // hop
    assert r % 2 == 0, "center trim must be hop-aligned (n_fft / hop must be even)"
    # NOTE: hop >= 128 keeps the OA accumulator / output stores lane-dense (production
    # hop = 1024); smaller hops still run but with masked partial stores.
    bc = b * c
    l_out = hop * (n_frames - 1)

    basis_np, env_inv_np, _ = _istft_constants(n_fft, hop, n_frames)
    k_dim = basis_np.shape[0]                           # 2 * n_freq

    # ---- tiling choices --------------------------------------------------------------
    f_tile, k_pad = _choose_f_tile(k_dim, f_tile_max)
    group = _choose_group(bc, group_max)
    n_groups = bc // group
    m_rows = group * n_frames
    itemsize = np.dtype(compute_dtype).itemsize
    if col_tile is None:
        col_tile = _choose_col_tile(n_fft, hop, m_rows, f_tile, itemsize)
    assert n_fft % col_tile == 0 and col_tile % hop == 0
    assert col_tile == n_fft or col_tile % 128 == 0
    rc = col_tile // hop
    n_cols = n_fft // col_tile
    n_f = k_pad // f_tile

    # ---- constant / input prep (cheap XLA glue vs the per-group basis matmul) --------
    basis_pad = np.zeros((k_pad, n_fft), np.float32)
    basis_pad[:k_dim] = basis_np
    basis = jnp.asarray(basis_pad, dtype=compute_dtype)            # (K_pad, n_fft)
    env_inv = jnp.asarray(env_inv_np, dtype=jnp.float32)           # (T-1, hop)

    spec = jnp.concatenate([spec_real, spec_imag], axis=2)         # (b, c, 2F, T)
    spec = spec.reshape(bc, k_dim, n_frames).astype(compute_dtype)
    spec = jnp.transpose(spec, (0, 2, 1))                          # (bc, T, 2F)
    if k_pad > k_dim:
        spec = jnp.pad(spec, ((0, 0), (0, 0), (0, k_pad - k_dim)))
    spec = spec.reshape(n_groups, m_rows, k_pad)                   # group items stacked in M

    kernel = _make_istft_kernel(group, n_frames, hop, rc, r)

    # ---- scheduler hints -------------------------------------------------------------
    flops = int(2 * n_groups * m_rows * k_pad * n_fft + bc * n_frames * n_fft)
    bytes_accessed = int(
        n_groups * n_cols * m_rows * k_pad * itemsize              # spec, re-read per col tile
        + n_groups * k_pad * n_fft * itemsize                      # basis, re-read per group
        + (n_frames - 1) * hop * 4                                 # envelope
        + bc * (n_frames - 1) * hop * 4)                           # output

    spec_blk = m_rows * f_tile * itemsize
    basis_blk = f_tile * col_tile * itemsize
    env_blk = (n_frames - 1) * hop * 4
    out_blk = group * (n_frames - 1) * hop * 4
    accmm_b = m_rows * col_tile * 4
    accoa_b = group * (n_frames + r - 1) * hop * 4
    vmem_need = 2 * (spec_blk + basis_blk + env_blk + out_blk) + accmm_b + accoa_b

    out = pl.pallas_call(
        kernel,
        out_shape=jax.ShapeDtypeStruct((bc, n_frames - 1, hop), jnp.float32),
        grid=(n_groups, n_cols, n_f),
        in_specs=[
            # spectrogram: rows = group*frames, cols = frequency tile
            pl.BlockSpec((1, m_rows, f_tile), lambda g, j, f: (g, 0, f)),
            # fused (cos ; sin) windowed DFT basis tile
            pl.BlockSpec((f_tile, col_tile), lambda g, j, f: (f, j)),
            # 1 / overlap-added window^2 envelope (constant block)
            pl.BlockSpec((n_frames - 1, hop), lambda g, j, f: (0, 0)),
        ],
        out_specs=pl.BlockSpec((group, n_frames - 1, hop), lambda g, j, f: (g, 0, 0)),
        scratch_shapes=[
            pltpu.VMEM((m_rows, col_tile), jnp.float32),                  # matmul accumulator
            pltpu.VMEM((group * (n_frames + r - 1), hop), jnp.float32),   # overlap-add acc
        ],
        compiler_params=pltpu.CompilerParams(
            dimension_semantics=("parallel", "arbitrary", "arbitrary"),
            vmem_limit_bytes=_vmem_limit_bytes(vmem_need)),
        cost_estimate=pl.CostEstimate(flops=flops, transcendentals=0,
                                      bytes_accessed=bytes_accessed),
    )(spec, basis, env_inv)

    y = out.reshape(b, c, l_out)
    if length is not None:
        if length <= l_out:
            y = y[..., :length]
        else:
            y = jnp.pad(y, ((0, 0), (0, 0), (0, length - l_out)))
    return y


# -------------------------------------- reference (JAX) --------------------------------------

def istft_reference(spec_real, spec_imag, n_fft, hop):
    """Pure-JAX reference matching torch.istft(hann, center=True, normalized=False)."""
    spec = spec_real.astype(jnp.float32) + 1j * spec_imag.astype(jnp.float32)
    b, c, _, n_frames = spec.shape
    win = jnp.asarray(_hann_periodic(n_fft), jnp.float32)
    frames = jnp.fft.irfft(spec, n=n_fft, axis=2) * win[None, None, :, None]
    l_full = n_fft + hop * (n_frames - 1)
    y = jnp.zeros((b, c, l_full), jnp.float32)
    env = jnp.zeros((l_full,), jnp.float32)
    for t in range(n_frames):
        y = y.at[:, :, t * hop:t * hop + n_fft].add(frames[:, :, :, t])
        env = env.at[t * hop:t * hop + n_fft].add(win ** 2)
    s = n_fft // 2
    l_out = hop * (n_frames - 1)
    return y[:, :, s:s + l_out] / env[s:s + l_out]


# ------------------------------------------- main -------------------------------------------

if __name__ == "__main__":
    # Small shapes with the module's n_fft / hop = 4 ratio (default 4096 / 1024);
    # hop = 128 keeps the overlap-add and output stores lane-dense.
    n_fft, hop = 512, 128
    batch, channels, n_frames = 2, 2, 8
    n_freq = n_fft // 2 + 1

    key = jax.random.PRNGKey(0)
    k_r, k_i = jax.random.split(key)
    spec_real = jax.random.normal(k_r, (batch, channels, n_freq, n_frames), jnp.float32)
    spec_imag = jax.random.normal(k_i, (batch, channels, n_freq, n_frames), jnp.float32)

    # col_tile=256 (< n_fft) exercises the column-tile grid axis and dynamic OA offsets.
    out = my_istft(spec_real, spec_imag, n_fft, hop, length=None, col_tile=256)
    out = jax.block_until_ready(out)

    ref = jax.block_until_ready(istft_reference(spec_real, spec_imag, n_fft, hop))
    assert out.shape == (batch, channels, hop * (n_frames - 1)), out.shape
    err = float(np.abs(np.asarray(out) - np.asarray(ref)).max())
    # bf16 basis / spectrogram with f32 accumulation: tolerance relaxed vs pure-f32 path
    assert np.allclose(np.asarray(out), np.asarray(ref), rtol=2e-2, atol=3e-3), err

    print("KERNEL_OK")
</pallas_src>

<mosaic_0001>
module attributes {stable_mosaic.version = 11 : i64} {
  func.func @kernel(%arg0: i32, %arg1: i32, %arg2: i32, %arg3: memref<1x16x128xbf16, #tpu.memory_space<vmem>>, %arg4: memref<128x256xbf16, #tpu.memory_space<vmem>>, %arg5: memref<7x128xf32, #tpu.memory_space<vmem>>, %arg6: memref<2x7x128xf32, #tpu.memory_space<vmem>>, %arg7: memref<16x256xf32, #tpu.memory_space<vmem>>, %arg8: memref<22x128xf32, #tpu.memory_space<vmem>>) attributes {dimension_semantics = [#tpu.dimension_semantics<parallel>, #tpu.dimension_semantics<arbitrary>, #tpu.dimension_semantics<arbitrary>], iteration_bounds = array<i64: 2, 2, 5>, scalar_prefetch = 0 : i64, scratch_operands = 2 : i64, tpu.core_type = #tpu.core_type<tc>, window_params = [{transform_indices = @transform_0, window_bounds = array<i64: 1, 16, 128>}, {transform_indices = @transform_1, window_bounds = array<i64: 128, 256>}, {pipeline_mode = #tpu.pipeline_mode<synchronous>, transform_indices = @transform_2, window_bounds = array<i64: 7, 128>}, {transform_indices = @transform_3, window_bounds = array<i64: 2, 7, 128>}]} {
    %c4_i32 = arith.constant 4 : i32
    %0 = arith.cmpi eq, %arg2, %c4_i32 : i32
    %c1_i32 = arith.constant 1 : i32
    %1 = arith.cmpi eq, %arg1, %c1_i32 : i32
    %c0_i32 = arith.constant 0 : i32
    %2 = arith.cmpi eq, %arg2, %c0_i32 : i32
    %3 = arith.extui %2 : i1 to i32
    %c0_i32_0 = arith.constant 0 : i32
    %4 = arith.cmpi ne, %3, %c0_i32_0 : i32
    scf.if %4 {
      %cst_14 = arith.constant 0.000000e+00 : f32
      %22 = vector.broadcast %cst_14 : f32 to vector<16x256xf32>
      %c0_15 = arith.constant 0 : index
      %c0_16 = arith.constant 0 : index
      %23 = vector.load %arg7[%c0_15, %c0_16] : memref<16x256xf32, #tpu.memory_space<vmem>>, vector<16x256xf32>
      tpu.vector_store %arg7[%c0_15, %c0_16], %22 {strides = array<i32>} : memref<16x256xf32, #tpu.memory_space<vmem>>, vector<16x256xf32>,
    } else {
    }
    %c0_i32_1 = arith.constant 0 : i32
    %5 = arith.cmpi eq, %arg1, %c0_i32_1 : i32
    %c0_i32_2 = arith.constant 0 : i32
    %6 = arith.cmpi eq, %arg2, %c0_i32_2 : i32
    %7 = arith.andi %5, %6 : i1
    %8 = arith.extui %7 : i1 to i32
    %c0_i32_3 = arith.constant 0 : i32
    %9 = arith.cmpi ne, %8, %c0_i32_3 : i32
    scf.if %9 {
      %cst_14 = arith.constant 0.000000e+00 : f32
      %22 = vector.broadcast %cst_14 : f32 to vector<22x128xf32>
      %c0_15 = arith.constant 0 : index
      %c0_16 = arith.constant 0 : index
      %23 = vector.load %arg8[%c0_15, %c0_16] : memref<22x128xf32, #tpu.memory_space<vmem>>, vector<22x128xf32>
      tpu.vector_store %arg8[%c0_15, %c0_16], %22 {strides = array<i32>} : memref<22x128xf32, #tpu.memory_space<vmem>>, vector<22x128xf32>,
    } else {
    }
    %c0 = arith.constant 0 : index
    %c0_4 = arith.constant 0 : index
    %10 = vector.load %arg7[%c0, %c0_4] : memref<16x256xf32, #tpu.memory_space<vmem>>, vector<16x256xf32>
    %c0_5 = arith.constant 0 : index
    %c0_6 = arith.constant 0 : index
    %c0_7 = arith.constant 0 : index
    %11 = vector.load %arg3[%c0_5, %c0_6, %c0_7] : memref<1x16x128xbf16, #tpu.memory_space<vmem>>, vector<1x16x128xbf16>
    %12 = vector.shape_cast %11 : vector<1x16x128xbf16> to vector<16x128xbf16>
    %c0_8 = arith.constant 0 : index
    %c0_9 = arith.constant 0 : index
    %13 = vector.load %arg4[%c0_8, %c0_9] : memref<128x256xbf16, #tpu.memory_space<vmem>>, vector<128x256xbf16>
    %cst = arith.constant dense<0.000000e+00> : vector<16x256xf32>
    %14 = tpu.matmul %12, %13, %cst {dimension_numbers = #tpu.dot_dimension_numbers<[1], [0], [0], [1], [0, 0, 1, 1], [], []>} : vector<16x128xbf16>, vector<128x256xbf16>, vector<16x256xf32> -> vector<16x256xf32>
    %15 = arith.addf %10, %14 : vector<16x256xf32>
    %c0_10 = arith.constant 0 : index
    %c0_11 = arith.constant 0 : index
    %16 = vector.load %arg7[%c0_10, %c0_11] : memref<16x256xf32, #tpu.memory_space<vmem>>, vector<16x256xf32>
    tpu.vector_store %arg7[%c0_10, %c0_11], %15 {strides = array<i32>} : memref<16x256xf32, #tpu.memory_space<vmem>>, vector<16x256xf32>,
    %17 = arith.extui %0 : i1 to i32
    %c0_i32_12 = arith.constant 0 : i32
    %18 = arith.cmpi ne, %17, %c0_i32_12 : i32
    scf.if %18 {
      %c0_14 = arith.constant 0 : index
      %c0_15 = arith.constant 0 : index
      %22 = vector.load %arg7[%c0_14, %c0_15] : memref<16x256xf32, #tpu.memory_space<vmem>>, vector<8x128xf32>
      %c2_i32 = arith.constant 2 : i32
      %23 = arith.muli %arg1, %c2_i32 : i32
      %c0_i32_16 = arith.constant 0 : i32
      %24 = arith.addi %c0_i32_16, %23 : i32
      %c0_i32_17 = arith.constant 0 : i32
      %25 = arith.addi %24, %c0_i32_17 : i32
      %26 = arith.index_cast %25 : i32 to index
      %c0_18 = arith.constant 0 : index
      %27 = vector.load %arg8[%26, %c0_18] : memref<22x128xf32, #tpu.memory_space<vmem>>, vector<8x128xf32>
      %28 = arith.addf %27, %22 : vector<8x128xf32>
      %29 = arith.index_cast %25 : i32 to index
      %c0_19 = arith.constant 0 : index
      %30 = vector.load %arg8[%29, %c0_19] : memref<22x128xf32, #tpu.memory_space<vmem>>, vector<8x128xf32>
      tpu.vector_store %arg8[%29, %c0_19], %28 {strides = array<i32>} : memref<22x128xf32, #tpu.memory_space<vmem>>, vector<8x128xf32>,
      %c0_20 = arith.constant 0 : index
      %c128 = arith.constant 128 : index
      %31 = vector.load %arg7[%c0_20, %c128] : memref<16x256xf32, #tpu.memory_space<vmem>>, vector<8x128xf32>
      %c2_i32_21 = arith.constant 2 : i32
      %32 = arith.muli %arg1, %c2_i32_21 : i32
      %c0_i32_22 = arith.constant 0 : i32
      %33 = arith.addi %c0_i32_22, %32 : i32
      %c1_i32_23 = arith.constant 1 : i32
      %34 = arith.addi %33, %c1_i32_23 : i32
      %35 = arith.index_cast %34 : i32 to index
      %c0_24 = arith.constant 0 : index
      %36 = vector.load %arg8[%35, %c0_24] : memref<22x128xf32, #tpu.memory_space<vmem>>, vector<8x128xf32>
      %37 = arith.addf %36, %31 : vector<8x128xf32>
      %38 = arith.index_cast %34 : i32 to index
      %c0_25 = arith.constant 0 : index
      %39 = vector.load %arg8[%38, %c0_25] : memref<22x128xf32, #tpu.memory_space<vmem>>, vector<8x128xf32>
      tpu.vector_store %arg8[%38, %c0_25], %37 {strides = array<i32>} : memref<22x128xf32, #tpu.memory_space<vmem>>, vector<8x128xf32>,
      %c8 = arith.constant 8 : index
      %c0_26 = arith.constant 0 : index
      %40 = vector.load %arg7[%c8, %c0_26] : memref<16x256xf32, #tpu.memory_space<vmem>>, vector<8x128xf32>
      %c2_i32_27 = arith.constant 2 : i32
      %41 = arith.muli %arg1, %c2_i32_27 : i32
      %c11_i32 = arith.constant 11 : i32
      %42 = arith.addi %c11_i32, %41 : i32
      %c0_i32_28 = arith.constant 0 : i32
      %43 = arith.addi %42, %c0_i32_28 : i32
      %44 = arith.index_cast %43 : i32 to index
      %c0_29 = arith.constant 0 : index
      %45 = vector.load %arg8[%44, %c0_29] : memref<22x128xf32, #tpu.memory_space<vmem>>, vector<8x128xf32>
      %46 = arith.addf %45, %40 : vector<8x128xf32>
      %47 = arith.index_cast %43 : i32 to index
      %c0_30 = arith.constant 0 : index
      %48 = vector.load %arg8[%47, %c0_30] : memref<22x128xf32, #tpu.memory_space<vmem>>, vector<8x128xf32>
      tpu.vector_store %arg8[%47, %c0_30], %46 {strides = array<i32>} : memref<22x128xf32, #tpu.memory_space<vmem>>, vector<8x128xf32>,
      %c8_31 = arith.constant 8 : index
      %c128_32 = arith.constant 128 : index
      %49 = vector.load %arg7[%c8_31, %c128_32] : memref<16x256xf32, #tpu.memory_space<vmem>>, vector<8x128xf32>
      %c2_i32_33 = arith.constant 2 : i32
      %50 = arith.muli %arg1, %c2_i32_33 : i32
      %c11_i32_34 = arith.constant 11 : i32
      %51 = arith.addi %c11_i32_34, %50 : i32
      %c1_i32_35 = arith.constant 1 : i32
      %52 = arith.addi %51, %c1_i32_35 : i32
      %53 = arith.index_cast %52 : i32 to index
      %c0_36 = arith.constant 0 : index
      %54 = vector.load %arg8[%53, %c0_36] : memref<22x128xf32, #tpu.memory_space<vmem>>, vector<8x128xf32>
      %55 = arith.addf %54, %49 : vector<8x128xf32>
      %56 = arith.index_cast %52 : i32 to index
      %c0_37 = arith.constant 0 : index
      %57 = vector.load %arg8[%56, %c0_37] : memref<22x128xf32, #tpu.memory_space<vmem>>, vector<8x128xf32>
      tpu.vector_store %arg8[%56, %c0_37], %55 {strides = array<i32>} : memref<22x128xf32, #tpu.memory_space<vmem>>, vector<8x128xf32>,
    } else {
    }
    %19 = arith.andi %0, %1 : i1
    %20 = arith.extui %19 : i1 to i32
    %c0_i32_13 = arith.constant 0 : i32
    %21 = arith.cmpi ne, %20, %c0_i32_13 : i32
    scf.if %21 {
      %c0_14 = arith.constant 0 : index
      %c0_15 = arith.constant 0 : index
      %22 = vector.load %arg5[%c0_14, %c0_15] : memref<7x128xf32, #tpu.memory_space<vmem>>, vector<7x128xf32>
      %c2 = arith.constant 2 : index
      %c0_16 = arith.constant 0 : index
      %23 = vector.load %arg8[%c2, %c0_16] : memref<22x128xf32, #tpu.memory_space<vmem>>, vector<7x128xf32>
      %24 = arith.mulf %23, %22 : vector<7x128xf32>
      %c0_17 = arith.constant 0 : index
      %c0_18 = arith.constant 0 : index
      %c0_19 = arith.constant 0 : index
      %25 = vector.load %arg6[%c0_17, %c0_18, %c0_19] : memref<2x7x128xf32, #tpu.memory_space<vmem>>, vector<1x7x128xf32>
      %26 = vector.shape_cast %25 : vector<1x7x128xf32> to vector<7x128xf32>
      %27 = vector.shape_cast %24 : vector<7x128xf32> to vector<1x7x128xf32>
      tpu.vector_store %arg6[%c0_17, %c0_18, %c0_19], %27 {strides = array<i32>} : memref<2x7x128xf32, #tpu.memory_space<vmem>>, vector<1x7x128xf32>,
      %c13 = arith.constant 13 : index
      %c0_20 = arith.constant 0 : index
      %28 = vector.load %arg8[%c13, %c0_20] : memref<22x128xf32, #tpu.memory_space<vmem>>, vector<7x128xf32>
      %29 = arith.mulf %28, %22 : vector<7x128xf32>
      %c1 = arith.constant 1 : index
      %c0_21 = arith.constant 0 : index
      %c0_22 = arith.constant 0 : index
      %30 = vector.load %arg6[%c1, %c0_21, %c0_22] : memref<2x7x128xf32, #tpu.memory_space<vmem>>, vector<1x7x128xf32>
      %31 = vector.shape_cast %30 : vector<1x7x128xf32> to vector<7x128xf32>
      %32 = vector.shape_cast %29 : vector<7x128xf32> to vector<1x7x128xf32>
      tpu.vector_store %arg6[%c1, %c0_21, %c0_22], %32 {strides = array<i32>} : memref<2x7x128xf32, #tpu.memory_space<vmem>>, vector<1x7x128xf32>,
    } else {
    }
    return
  }
  func.func @transform_0(%arg0: i32, %arg1: i32, %arg2: i32) -> (i32, i32, i32) {
    %c0_i32 = arith.constant 0 : i32
    %c0_i32_0 = arith.constant 0 : i32
    return %arg0, %c0_i32, %arg2 : i32, i32, i32
  }
  func.func @transform_1(%arg0: i32, %arg1: i32, %arg2: i32) -> (i32, i32) {
    %c0_i32 = arith.constant 0 : i32
    return %arg2, %arg1 : i32, i32
  }
  func.func @transform_2(%arg0: i32, %arg1: i32, %arg2: i32) -> (i32, i32) {
    %c0_i32 = arith.constant 0 : i32
    %c0_i32_0 = arith.constant 0 : i32
    %c0_i32_1 = arith.constant 0 : i32
    return %c0_i32, %c0_i32_0 : i32, i32
  }
  func.func @transform_3(%arg0: i32, %arg1: i32, %arg2: i32) -> (i32, i32, i32) {
    %c0_i32 = arith.constant 0 : i32
    %c0_i32_0 = arith.constant 0 : i32
    %c0_i32_1 = arith.constant 0 : i32
    return %arg0, %c0_i32, %c0_i32_0 : i32, i32, i32
  }
}

</mosaic_0001>

<bundles_post_ra>
// kernel: tpu_custom_call.1
= control target key start
LH: loop header
LB: loop body
LE: loop exit
PB: predicated region body
PF: predicated region fallthrough
CT: control target
= control target key end

     0   :  { %s1352_s0 = inlined_call_operand.hbm [shape: bf16[2,16,640], index: 0, kind: input, shape index: {}]   ;;  %s1353_s1 = inlined_call_operand.hbm [shape: bf16[640,512], index: 1, kind: input, shape index: {}]   ;;  %s1354_s2 = inlined_call_operand.hbm [shape: f32[7,128], index: 2, kind: input, shape index: {}]   ;;  %s1355_s3 = inlined_call_operand.vmem [shape: f32[4,7,128], index: 3, kind: output, shape index: {}]  }
   0x1   :  { %1368 = sst [smem:[#allocation18_spill]] %s1352_s0 }
   0x2   :  { %1369 = sst [smem:[#allocation19_spill]] %s1354_s2 }
   0x3   :  { %1370 = sst [smem:[#allocation20_spill]] %s1355_s3 }
   0x4   :  { %8 = vsyncpa [#allocation5], 0 }
   0x5   :  { %10 = vsyncpa [#allocation5 + $0x1], 0 }
   0x6   :  { %11 = vsyncpa [#allocation7], 0 }
   0x7   :  { %13 = vsyncpa [#allocation7 + $0x1], 0  ;;  %s1066_s12 = smov 0   ;;  %s1068_s13 = smov 0  }
   0x8   :  { %s1070_s14 = smov 0   ;;  %s1072_s15 = smov 0  }
   0x9   :  { %s1074_s16 = smov 0   ;;  %s1076_s17 = smov 0  }
   0xa   :  { %s1078_s18 = smov 0   ;;  %s1080_s19 = smov 0  }
   0xb   :  { %s1082_s20 = smov 0   ;;  %s1084_s21 = smov 0  }
   0xc   :  { %s1086_s22 = smov 0   ;;  %s1088_s23 = smov 0  }
   0xd   :  { %s1090_s24 = smov 0  }
   0xe LB: > { %1371 = sst [smem:[#allocation12_spill]] %s1008_s18  ;;  %s1361_s25 = sadd.s32 4294967295, %s1032_s24   ;;  %s1032_s24 = sphi %s1090_s24, %s19_s24   ;;  %s1028_s23 = sphi %s1088_s23, %s1421_s23   ;;  %s1024_s22 = sphi %s1086_s22, %s1420_s22   ;;  %s1020_s21 = sphi %s1084_s21, %s1419_s21   ;;  %s1016_s20 = sphi %s1082_s20, %s1418_s20   ;;  %s1012_s19 = sphi %s1080_s19, %s1417_s19   ;;  %s1008_s18 = sphi %s1078_s18, %s1416_s18   ;;  %s1004_s17 = sphi %s1076_s17, %s1415_s17   ;;  %s1000_s16 = sphi %s1074_s16, %s1414_s16   ;;  %s996_s15 = sphi %s1072_s15, %s1413_s15   ;;  %s992_s14 = sphi %s1070_s14, %s1412_s14   ;;  %s988_s13 = sphi %s1068_s13, %s1411_s13   ;;  %s984_s12 = sphi %s1066_s12, %s1410_s12  }
   0xf   : > { %1372 = sst [smem:[#allocation13_spill]] %s1012_s19  ;;  %p54_p0 = scmp.ne.s32.totalorder %s1004_s17, %s1000_s16 }
  0x10   : > { %1373 = sst [smem:[#allocation14_spill]] %s1016_s20  ;;  %p55_p1 = scmp.eq.s32.totalorder %s1032_s24, 0 }
  0x11   : > { %p60_p2 = scmp.ne.s32.totalorder %s1000_s16, %s996_s15  ;;  %p1135_p3 = scmp.eq.s32.totalorder %s1361_s25, 0 }
  0x12   : > { %p1139_p4 = por %p55_p1, %p54_p0  ;;  %p82_p6 = scmp.ne.s32.totalorder %s992_s14, %s988_s13 }
  0x13   : > { %s1374_s27 = scalar_select %p1135_p3, 1, 0 }
  0x14   : > { %p1146_p5 = por %p1135_p3, %p60_p2  ;;  %p88_p7 = scmp.ne.s32.totalorder %s988_s13, %s984_s12 }
  0x15   : > { %1375 = sst [smem:[#allocation15_spill]] %s1374_s27  ;;  %p625_p8 = scmp.ge.s32.totalorder %s1032_s24, 1 }
  0x16   : > { %s1377_s30 = scalar_select %p1146_p5, 1, 0 }
  0x17   : > { %p84_p9 = por %p82_p6, %p55_p1  ;;  %p146_p10 = scmp.lt.s32.totalorder %s1032_s24, 21 }
  0x18   : > { %p1157_p11 = por %p88_p7, %p1135_p3  ;;  %s1034_s6 = smov [#allocation8]  }
  0x19   : > { %p1161_p12 = pnand %p625_p8, %p146_p10  ;;  %s159_s7 = sshll.u32 %s1034_s6, 4  ;;  %s160_s7 = int_to_ptr.vmem [resolvable:$true] %s159_s7 }
  0x1a   : > { %s1378_s4 = scalar_select %p1157_p11, 1, 0 }
  0x1b   : > { %s1380_s5 = scalar_select %p1161_p12, 1, 0 }
  0x1c   : > { %1379 = sst [smem:[#allocation16_spill]] %s1378_s4  ;;  %p683_p13 = pneg %p1161_p12 }
  0x1d   : > { %p695_p0 = scmp.lt.s32.totalorder %s1032_s24, 20  ;;  %s847_s10 = scalar_lea.vmem %s160_s7, 128 }
  0x1e   : > { %p684_p2 = pnand %p683_p13, %p1135_p3  ;;  %p848_p8 = scmp.ne.s32.totalorder %s160_s7, %s847_s10 }
  0x1f   : > { %p1172_p1 = pnand %p695_p0, %p1139_p4  ;;  %p1176_p6 = pnand %p695_p0, %p84_p9 }
  0x20   : > { %p838_p7 = pneg %p684_p2  ;;  %p855_p5 = scmp.lt.s32.totalorder %s160_s7, %s160_s7 }
  0x21   : > { %p856_p12 = scmp.lt.s32.totalorder %s847_s10, %s847_s10 }
  0x22   : > { %p850_p10 = pnand %p848_p8, %p838_p7 }
  0x23   : > { %p857_p3 = por %p856_p12, %p855_p5 }
  0x24   : > { %p851_p11 = pneg %p850_p10 }
  0x26   : > { %p858_p13 = pnand %p857_p3, %p851_p11 }
  0x28   : > { %861 = shalt.err (!%p858_p13)
}
  0x29   : > { %s1383_s2 = sld [smem:[#allocation19_spill]]  ;;  %s31_s28 = sadd.s32 1, %s1020_s21 }
  0x2a   : > { %s170_s6 = sand.u32 1, %s1004_s17   ;;  %p1186_p4 = scmp.ge.s32.totalorder %s31_s28, 5 }
  0x2b   : > { %s628_s10 = sshll.u32 %s170_s6, 3  ;;  %s674_s26 = smul.u32 10, %s1028_s23 }
  0x2c   : > { %s1423_s28 = smov (%p1186_p4, %s31_s28), 0  ;;  %s1385_s0 = sld [smem:[#allocation18_spill]] }
  0x2d   : > { %s179_s11 = sadd.s32 %s1020_s21, %s674_s26  ;;  %s1198_s12 = ssub.s32 %s1020_s21, %s1423_s28 }
  0x2e   : > { %s629_s29 = sshll.u32 %s179_s11, 6  ;;  %s174_s3 = scalar_lea.vmem [#allocation4], %s628_s10 }
  0x2f   : > { %686 = dma.hbm_to_vmem [thread:$0]  (!%p684_p2), %s1383_s2, 128, %s160_s7, [#allocation7]  }
  0x30   : > { %s182_s19 = sshll.u32 %s174_s3, 4  ;;  %s171_s18 = scalar_lea.sflag [#allocation5], %s170_s6  ;;  %s183_s19 = int_to_ptr.vmem [resolvable:$true] %s182_s19 }
  0x31   : > { %p864_p3 = pneg %p1172_p1  ;;  %s875_s20 = scalar_lea.vmem %s183_s19, 128 }
  0x32   : > { %s181_s15 = scalar_lea.hbm %s1385_s0, %s629_s29  ;;  %p876_p5 = scmp.ne.s32.totalorder %s183_s19, %s875_s20 }
  0x33   : > { %s1035_s27 = smov [#allocation4]  }
  0x34   : > { %p878_p9 = pnand %p876_p5, %p864_p3  ;;  %s880_s4 = sshll.u32 %s1035_s27, 4  ;;  %s881_s4 = int_to_ptr.vmem [resolvable:$false] %s880_s4 }
  0x35   : > { %s882_s26 = scalar_lea.vmem %s881_s4, 256  ;;  %p883_p12 = scmp.lt.s32.totalorder %s183_s19, %s881_s4 }
  0x36   : > { %p879_p11 = pneg %p878_p9  ;;  %p884_p0 = scmp.lt.s32.totalorder %s882_s26, %s875_s20 }
  0x38   : > { %p885_p2 = por %p884_p0, %p883_p12 }
  0x3a   : > { %p886_p7 = pnand %p885_p2, %p879_p11 }
  0x3c   : > { %889 = shalt.err (!%p886_p7)
}
  0x3d   : > { %s1036_s2 = smov 320   ;;  %s1037_s3 = smov 64  }
  0x3e   : > { %s1038_s27 = smov 4   ;;  %s192_s20 = sand.u32 1, %s1032_s24  }
  0x3f   : > { %690 = dma.hbm_to_vmem [thread:$0]  (!%p1172_p1), %s181_s15, 128, %s183_s19, %s171_s18, %s1036_s2, %s1037_s3, %s1038_s27  }
  0x40   : > { %s34_s29 = sadd.s32 1, %s1024_s22  ;;  %s194_s4 = sand.u32 1, %s992_s14  }
  0x41   : > { %s1425_s29 = smov (!%p1186_p4, %s34_s29), %s1024_s22  ;;  %s630_s6 = sshll.u32 %s194_s4, 7 }
  0x42   : > { %s632_s10 = sshll.u32 %s1024_s22, 1  ;;  %p36_p8 = scmp.ge.s32.totalorder %s1425_s29, 2 }
  0x43   : > { %s673_s11 = sshll.u32 %s1020_s21, 6  ;;  %s196_s7 = scalar_lea.vmem [#allocation6], %s630_s6 }
  0x44   : > { %s206_s26 = sshll.u32 %s196_s7, 4  ;;  %s1427_s29 = smov (%p36_p8, %s1425_s29), 0  ;;  %s207_s26 = int_to_ptr.vmem [resolvable:$true] %s206_s26 }
  0x45   : > { %1386 = sst [smem:[#allocation17_spill]] %s1427_s29  ;;  %s1387_s18 = sadd.s32 1, %s1028_s23 }
  0x46   : > { %s1429_s18 = smov (!%p36_p8, %s1387_s18), %s1028_s23  ;;  %s71_s19 = ssub.s32 %s1024_s22, %s1427_s29 }
  0x47   : > { %s203_s25 = sadd.s32 %s673_s11, %s632_s10  ;;  %p40_p1 = scmp.ge.s32.totalorder %s1429_s18, 2 }
  0x48   : > { %s72_s8 = sor.u32 %s71_s19, %s1198_s12  ;;  %s634_s15 = sshll.u32 %s203_s25, 6 }
  0x49   : > { %p73_p10 = scmp.eq.s32.totalorder %s72_s8, 0  ;;  %s1431_s18 = smov (%p40_p1, %s1429_s18), 0 }
  0x4a   : > { %s1388_s2 = sadd.s32 1, %s992_s14  ;;  %s42_s27 = ssub.s32 %s1028_s23, %s1431_s18 }
  0x4b   : > { %s1228_s3 = scalar_select %p73_p10, %s992_s14, %s1388_s2  }
  0x4c   : > { %s205_s7 = scalar_lea.hbm %s1353_s1, %s634_s15  ;;  %s44_s0 = sor.u32 %s1198_s12, %s42_s27 }
  0x4d   : > { %p45_p13 = scmp.eq.s32.totalorder %s44_s0, 0  ;;  %s1389_s29 = sadd.s32 1, %s1004_s17 }
  0x4e   : > { %s193_s11 = scalar_lea.sflag [#allocation7], %s192_s20  ;;  %p892_p4 = pneg %p1176_p6 }
  0x4f   : > { %s1239_s10 = scalar_select %p45_p13, %s1004_s17, %s1389_s29  }
  0x50   : > { %s903_s19 = scalar_lea.vmem %s207_s26, 2048  ;;  %s1039_s25 = smov [#allocation6]  }
  0x51   : > { %p904_p3 = scmp.ne.s32.totalorder %s207_s26, %s903_s19  ;;  %s908_s8 = sshll.u32 %s1039_s25, 4  ;;  %s909_s8 = int_to_ptr.vmem [resolvable:$false] %s908_s8 }
  0x52   : > { %s910_s2 = scalar_lea.vmem %s909_s8, 4096  ;;  %p911_p11 = scmp.lt.s32.totalorder %s207_s26, %s909_s8 }
  0x53   : > { %p906_p5 = pnand %p904_p3, %p892_p4  ;;  %p912_p12 = scmp.lt.s32.totalorder %s910_s2, %s903_s19 }
  0x55   : > { %p907_p9 = pneg %p906_p5  ;;  %p913_p0 = por %p912_p12, %p911_p11 }
  0x57   : > { %p914_p2 = pnand %p913_p0, %p907_p9 }
  0x59   : > { %917 = shalt.err (!%p914_p2)
}
  0x5a   : > { %s1040_s0 = smov 256   ;;  %s1041_s12 = smov 128  }
  0x5b   : > { %s1042_s29 = smov 8   ;;  %p1390_p7 = scmp.ne.s32.totalorder %s1380_s5, 0 }
  0x5c   : > { %693 = dma.hbm_to_vmem [thread:$0]  (!%p1176_p6), %s205_s7, 2048, %s207_s26, %s193_s11, %s1040_s0, %s1041_s12, %s1042_s29  }
  0x5d   : > { %218 = sbr.rel (%p1390_p7) target bundleno = 419 (0x1a3), region = 32  ;;  %s220_s20 = sand.u32 (!%p1390_p7), 1, %s1000_s16  }
  0x5e   : > { %s1248_s15 = sshll.u32 (!%p1390_p7), %s220_s20, 3  ;;  %s221_s27 = scalar_lea.sflag (!%p1390_p7), [#allocation5], %s220_s20 }
  0x5f   : > { %s224_s4 = scalar_lea.vmem (!%p1390_p7), [#allocation4], %s1248_s15  ;;  %p1391_p8 = scmp.ne.s32.totalorder (!%p1390_p7), %s1377_s30, 0 }
  0x62   : > { %971 = dma.done.wait (%p1391_p8), %s221_s27, 128  }
  0x63   : > { %973 = vsyncadd (%p1391_p8), %s221_s27, 4294967168  ;;  %s1392_s6 = sadd.s32 4294967295, %s1032_s24   ;;  %s1393_s9 = sld [smem:[#allocation16_spill]] }
  0x64   : > { %s229_s26 = sand.u32 1, %s1392_s6   ;;  %s231_s5 = sand.u32 1, %s988_s13  }
  0x65   : > { %s637_s7 = sshll.u32 %s231_s5, 7  ;;  %s230_s11 = scalar_lea.sflag [#allocation7], %s229_s26 }
  0x66   : > { %s1258_s19 = scalar_lea.vmem [#allocation6], %s637_s7 }
  0x69   : > { %p1394_p6 = scmp.ne.s32.totalorder %s1393_s9, 0 }
  0x6b   : > { %975 = dma.done.wait (%p1394_p6), %s230_s11, 2048  }
  0x6c   : > { %977 = vsyncadd (%p1394_p6), %s230_s11, 4294965248  ;;  %s1395_s25 = sld [smem:[#allocation15_spill]] }
  0x72   : > { %p1396_p1 = scmp.ne.s32.totalorder %s1395_s25, 0 }
  0x74   : > { %979 = dma.done.wait (%p1396_p1), [#allocation7], 128  }
  0x75   : > { %981 = vsyncadd (%p1396_p1), [#allocation7], 4294967168  ;;  %s1397_s30 = sld [smem:[#allocation14_spill]] }
  0x76   : > { %s1398_s8 = sld [smem:[#allocation12_spill]] }
  0x77   : > { %s1399_s2 = sld [smem:[#allocation13_spill]] }
  0x78   : > { %s1400_s27 = sld [smem:[#allocation20_spill]] }
  0x7b   : > { %s639_s0 = sshll.u32 %s1397_s30, 1 }
  0x7c   : > { %p274_p10 = scmp.eq.s32.totalorder %s1398_s8, 4  ;;  %p268_p13 = scmp.lt.s32.totalorder %s639_s0, 3 }
  0x7d   : > { %p275_p4 = scmp.eq.s32.totalorder %s1399_s2, 1  ;;  %p276_p3 = scmp.eq.s32.totalorder %s1398_s8, 0 }
  0x7e   : > { %s1433_s0 = smov (!%p268_p13, %s639_s0), 3  ;;  %p641_p5 = scmp.ne.s32.totalorder %s1398_s8, 0 }
  0x7f   : > { %s640_s12 = sshll.u32 %s1433_s0, 3 }
  0x80   : > { %s1275_s6 = scalar_lea.vmem %s1400_s27, %s640_s12  ;;  %279 = sbr.rel (%p641_p5) target bundleno = 136 (0x88), region = 48 }
  0x85   : > { %v1043_v0 = vmov 0.0  }
  0x86   : > { %280 = vst [vmem:[#allocation2 + $0x10] sm:$0xff] %v1043_v0  ;;  %281 = vst [vmem:[#allocation2] sm:$0xff] %v1043_v0 }
  0x87   : > { %282 = vst [vmem:[#allocation2 + $0x18] sm:$0xff] %v1043_v0  ;;  %283 = vst [vmem:[#allocation2 + $0x8] sm:$0xff] %v1043_v0 }
  0x88 PF: > { %s1401_s9 = sld [smem:[#allocation13_spill]] }
  0x8e   : > { %p284_p9 = scmp.eq.s32.totalorder %s1401_s9, 0 }
  0x90   : > { %p285_p11 = pnand %p284_p9, %p276_p3 }
  0x92   : > { %288 = sbr.rel (%p285_p11) target bundleno = 154 (0x9a), region = 52 }
  0x97   : > { %v1044_v1 = vmov 0.0  }
  0x98   : > { %289 = vst [vmem:[#allocation3] sm:$0xff] %v1044_v1  ;;  %290 = vst [vmem:[#allocation3 + $0x8] sm:$0xff] %v1044_v1 }
  0x99   : > { %291 = vst [vmem:[#allocation3 + $0x10] sm:$0x3f] %v1044_v1 }
  0x9a PF: > { %v811_v2 = vld [vmem:[%s1258_s19 + $0x74] ss:$8 sps:$4 sm:$0xff]   ;;  %v813_v3 = vld [vmem:[%s1258_s19 + $0x70] ss:$8 sps:$4 sm:$0xff]   ;;  %v1045_v4 = vmov 0   ;;  %v292_v20 = vld [vmem:[#allocation2 + $0x10] sm:$0xff] }
  0x9b   : > { %432 = vmatprep.mubr.bf16.mxu0 %v1045_v4  ;;  %400 = vmatprep.subr.bf16.mxu0 %v811_v2  ;;  %v814_v5 = vld [vmem:[%s1258_s19 + $0x64] ss:$8 sps:$4 sm:$0xff]   ;;  %v816_v6 = vld [vmem:[%s1258_s19 + $0x60] ss:$8 sps:$4 sm:$0xff]   ;;  %v817_v7 = vld [vmem:[%s1258_s19 + $0x54] ss:$8 sps:$4 sm:$0xff]  }
  0x9c   : > { %401 = vmatpush1.bf16.msra.mxu0 %v813_v3  ;;  %v819_v8 = vld [vmem:[%s1258_s19 + $0x50] ss:$8 sps:$4 sm:$0xff]   ;;  %v820_v9 = vld [vmem:[%s1258_s19 + $0x44] ss:$8 sps:$4 sm:$0xff]   ;;  %v822_v10 = vld [vmem:[%s1258_s19 + $0x40] ss:$8 sps:$4 sm:$0xff]  }
  0x9d   : > { %402 = vmatprep.subr.bf16.mxu0 %v814_v5  ;;  %v823_v11 = vld [vmem:[%s1258_s19 + $0x34] ss:$8 sps:$4 sm:$0xff]   ;;  %v825_v12 = vld [vmem:[%s1258_s19 + $0x30] ss:$8 sps:$4 sm:$0xff]   ;;  %v826_v13 = vld [vmem:[%s1258_s19 + $0x24] ss:$8 sps:$4 sm:$0xff]  }
  0x9e   : > { %v828_v14 = vld [vmem:[%s1258_s19 + $0x20] ss:$8 sps:$4 sm:$0xff]   ;;  %v829_v15 = vld [vmem:[%s1258_s19 + $0x14] ss:$8 sps:$4 sm:$0xff]   ;;  %v831_v16 = vld [vmem:[%s1258_s19 + $0x10] ss:$8 sps:$4 sm:$0xff]  }
  0x9f   : > { %v832_v17 = vld [vmem:[%s1258_s19 + $0x4] ss:$8 sps:$4 sm:$0xff]   ;;  %v834_v18 = vld [vmem:[%s1258_s19] ss:$8 sps:$4 sm:$0xff]   ;;  %v835_v19 = vld [vmem:[%s224_s4] sm:$0xff]   ;;  %s1403_s15 = sld [smem:[#allocation12_spill]] }
  0xa0   : > { %403 = vmatpush1.bf16.msra.mxu0 %v816_v6  ;;  %v293_v22 = vld [vmem:[#allocation2] sm:$0xff]  ;;  %v294_v25 = vld [vmem:[#allocation2 + $0x18] sm:$0xff]  ;;  %v295_v28 = vld [vmem:[#allocation2 + $0x8] sm:$0xff] }
  0xa1   : > { %404 = vmatprep.subr.bf16.mxu0 %v817_v7 }
  0xa4   : > { %405 = vmatpush1.bf16.msra.mxu0 %v819_v8 }
  0xa5   : > { %406 = vmatprep.subr.bf16.mxu0 %v820_v9  ;;  %p659_p12 = scmp.ne.s32.totalorder %s1403_s15, 4 }
  0xa6   : > { %s1404_s4 = sld [smem:[#allocation13_spill]] (!%p659_p12) }
  0xa8   : > { %407 = vmatpush1.bf16.msra.mxu0 %v822_v10 }
  0xa9   : > { %408 = vmatprep.subr.bf16.mxu0 %v823_v11 }
  0xac   : > { %409 = vmatpush1.bf16.msra.mxu0 %v825_v12  ;;  %s660_s5 = sshll.u32 (!%p659_p12), %s1404_s4, 1 }
  0xad   : > { %410 = vmatprep.subr.bf16.mxu0 %v826_v13  ;;  %s456_s7 = scalar_lea.vmem (!%p659_p12), [#allocation3], %s660_s5 }
  0xb0   : > { %411 = vmatpush1.bf16.msra.mxu0 %v828_v14 }
  0xb1   : > { %412 = vmatprep.subr.bf16.mxu0 %v829_v15 }
  0xb4   : > { %413 = vmatpush1.bf16.msra.mxu0 %v831_v16 }
  0xb5   : > { %414 = vmatprep.subr.bf16.mxu0 %v832_v17 }
  0xb8   : > { %415 = vmatpush1.bf16.msra.mxu0 %v834_v18 }
  0xbb   : > { %433 = vmatmul.mubr.bf16.vlgmr.msra.gmra.mxu0 %v835_v19 }
 0x17b   : > { %v434_v21 = vpop.f32.mrf.mxu0 }
 0x17c   : > { %v443_v23 = vadd.f32 %v434_v21, %v292_v20 }
 0x17d   : > { %v436_v24 = vpop.f32.mrf.mxu0 }
 0x17e   : > { %447 = vst [vmem:[#allocation2 + $0x10] sm:$0xff] %v443_v23  ;;  %v444_v26 = vadd.f32 %v436_v24, %v293_v22 }
 0x17f   : > { %v438_v27 = vpop.f32.mrf.mxu0 }
 0x180   : > { %448 = vst [vmem:[#allocation2] sm:$0xff] %v444_v26  ;;  %v445_v29 = vadd.f32 %v438_v27, %v294_v25  ;;  %453 = sbr.rel (%p659_p12) target bundleno = 407 (0x197), region = 56 }
 0x181   : > { %v440_v30 = vpop.f32.mrf.mxu0 }
 0x182   : > { %449 = vst [vmem:[#allocation2 + $0x18] sm:$0xff] %v445_v29  ;;  %v446_v31 = vadd.f32 %v440_v30, %v295_v28 }
 0x184   : > { %450 = vst [vmem:[#allocation2 + $0x8] sm:$0xff] %v446_v31 }
 0x185   : > { %v454_v32 = vld [vmem:[#allocation2 + $0x10] sm:$0xff]  ;;  %v457_v34 = vld [vmem:[%s456_s7] sm:$0xff] }
 0x186   : > { %v665_v35 = vld [vmem:[%s456_s7 + $0xb] sm:$0xff]  ;;  %v458_v36 = vadd.f32 %v457_v34, %v454_v32 }
 0x187   : > { %v460_v38 = vld [vmem:[#allocation2] sm:$0xff] }
 0x188   : > { %459 = vst [vmem:[%s456_s7] sm:$0xff] %v458_v36 }
 0x189   : > { %v466_v33 = vld [vmem:[#allocation2 + $0x18] sm:$0xff] }
 0x18a   : > { %v470_v37 = vadd.f32 %v665_v35, %v466_v33 }
 0x18b   : > { %v472_v39 = vld [vmem:[#allocation2 + $0x8] sm:$0xff] }
 0x18c   : > { %666 = vst [vmem:[%s456_s7 + $0xb] sm:$0xff] %v470_v37 }
 0x18f   : > { %v662_v40 = vld [vmem:[%s456_s7 + $0x1] sm:$0xff] }
 0x190   : > { %v464_v42 = vadd.f32 %v662_v40, %v460_v38 }
 0x192   : > { %663 = vst [vmem:[%s456_s7 + $0x1] sm:$0xff] %v464_v42 }
 0x193   : > { %v668_v41 = vld [vmem:[%s456_s7 + $0xc] sm:$0xff] }
 0x194   : > { %v476_v43 = vadd.f32 %v668_v41, %v472_v39 }
 0x196   : > { %669 = vst [vmem:[%s456_s7 + $0xc] sm:$0xff] %v476_v43 }
 0x197 PF: > { %p478_p0 = pnand %p275_p4, %p274_p10 }
 0x199   : > { %481 = sbr.rel (%p478_p0) target bundleno = 419 (0x1a3), region = 60 }
 0x19e   : > { %v482_v44 = vld [vmem:[#allocation8] sm:$0x7f] }
 0x19f   : > { %v483_v45 = vld [vmem:[#allocation3 + $0x2] sm:$0x7f]  ;;  %v486_v46 = vld [vmem:[#allocation3 + $0xd] sm:$0x7f] }
 0x1a0   : > { %v484_v47 = vmul.f32 %v483_v45, %v482_v44  ;;  %v487_v48 = vmul.f32 %v486_v46, %v482_v44 }
 0x1a2   : > { %485 = vst [vmem:[%s1275_s6] sm:$0x7f] %v484_v47  ;;  %670 = vst [vmem:[%s1275_s6 + $0x8] sm:$0x7f] %v487_v48 }
 0x1a3 PF: > { %s19_s24 = sadd.s32 1, %s1032_s24   ;;  %s1408_s30 = sld [smem:[#allocation17_spill]] }
 0x1a4   : > { %p1308_p2 = scmp.ge.s32.totalorder %s19_s24, 22   ;;  %s1409_s8 = smov %s1431_s18 }
 0x1a5   : > { %s1410_s12 = smov %s988_s13  ;;  %s1411_s13 = smov %s992_s14 }
 0x1a6   : > { %s1412_s14 = smov %s1228_s3  ;;  %s1413_s15 = smov %s1000_s16 }
 0x1a7   : > { %s1414_s16 = smov %s1004_s17  ;;  %s1415_s17 = smov %s1239_s10 }
 0x1a8   : > { %s1416_s18 = smov %s1020_s21  ;;  %s1417_s19 = smov %s1024_s22 }
 0x1a9   : > { %s1418_s20 = smov %s1028_s23  ;;  %s1419_s21 = smov %s1423_s28 }
 0x1aa   : > { %s1420_s22 = smov %s1408_s30  ;;  %s1421_s23 = smov %s1409_s8 }
 0x1ab   :  { %18 = sbr.rel (!%p1308_p2) target bundleno = 14 (0xe), region = 110 }
 0x1b0   :  { %512 = vsyncpa [#allocation5], 1 }
 0x1b1   :  { %514 = vsyncpa [#allocation5 + $0x1], 1 }
 0x1b2   :  { %515 = vsyncpa [#allocation7], 1 }
 0x1b3   :  { %517 = vsyncpa [#allocation7 + $0x1], 1 }

</bundles_post_ra>
